<compile_context>
chip_gen: v7x
topology: tpu7x:2x2x1
jax: 0.10.0
libtpu: 0.0.40
codegen_flags: <defaults>
</compile_context>

<pallas_src>
import functools

import jax
import jax.numpy as jnp
from jax import lax
from jax.experimental import pallas as pl
from jax.experimental.pallas import tpu as pltpu

EPS = 1e-5  # nn.InstanceNorm2d default


def _adain_kernel(hw_total, g1_ref, b_ref, x_ref, o_ref, mean_ref, rstd_ref):
    """Grid point (b, p, t): p=0 accumulates stats, p=1 normalizes tile t."""
    p = pl.program_id(1)
    t = pl.program_id(2)
    nt = pl.num_programs(2)

    @pl.when(p == 0)
    def _stats_pass():
        @pl.when(t == 0)
        def _init():
            mean_ref[...] = jnp.zeros_like(mean_ref)
            rstd_ref[...] = jnp.zeros_like(rstd_ref)

        x = x_ref[0].astype(jnp.float32)                          # (C, THW)
        mean_ref[...] += jnp.sum(x, axis=-1, keepdims=True)       # running sum
        rstd_ref[...] += jnp.sum(x * x, axis=-1, keepdims=True)   # running sumsq

        @pl.when(t == nt - 1)
        def _finalize():
            inv_n = jnp.float32(1.0 / hw_total)
            mean = mean_ref[...] * inv_n
            var = jnp.maximum(rstd_ref[...] * inv_n - mean * mean, 0.0)
            mean_ref[...] = mean                                  # now holds mean
            rstd_ref[...] = lax.rsqrt(var + EPS)                  # now holds rstd

    @pl.when(p == 1)
    def _normalize_pass():
        x = x_ref[0].astype(jnp.float32)                          # (C, THW)
        xn = (x - mean_ref[...]) * rstd_ref[...]
        o_ref[0] = (g1_ref[0] * xn + b_ref[0]).astype(o_ref.dtype)


def _pick_hw_tile(C, HW, itemsize, budget_bytes):
    """Largest lane-dense (multiple-of-128) divisor of HW fitting the budget."""
    # rough per-element VMEM cost: 2x double-buffered (in + out) + fp32 temps
    per_elem = 4 * itemsize + 8
    max_thw = max(128, budget_bytes // max(1, per_elem * C))
    if HW <= max_thw:
        return HW
    t = (min(max_thw, HW) // 128) * 128
    while t >= 128:
        if HW % t == 0:
            return t
        t -= 128
    return HW  # no lane-dense divisor; fall back to full spatial extent


def adain_nchw(x_nchw, s, fc_w, fc_b, *, vmem_budget_bytes=20 * 1024 * 1024):
    """AdaIN forward. x_nchw: (B, C, H, W); s: (B, S); fc_w: (2C, S); fc_b: (2C,)."""
    B, C, H, W = x_nchw.shape
    HW = H * W

    # Style FC hoisted out of the grid: one small (B,S)@(S,2C) matmul for all b.
    h = s.astype(jnp.float32) @ fc_w.astype(jnp.float32).T + fc_b.astype(jnp.float32)
    gamma1 = (1.0 + h[:, :C]).reshape(B, C, 1)     # (1 + gamma), matches torch.chunk
    beta = h[:, C:].reshape(B, C, 1)

    # Free contiguous view: NCHW -> (B, C, HW). No transposes touch HBM.
    x = x_nchw.reshape(B, C, HW)

    thw = _pick_hw_tile(C, HW, x.dtype.itemsize, vmem_budget_bytes)
    n_tiles = HW // thw

    kernel = functools.partial(_adain_kernel, HW)

    out = pl.pallas_call(
        kernel,
        out_shape=jax.ShapeDtypeStruct((B, C, HW), x.dtype),
        grid_spec=pltpu.PrefetchScalarGridSpec(
            num_scalar_prefetch=0,
            grid=(B, 2, n_tiles),           # (batch, stats|normalize pass, spatial tile)
            in_specs=[
                pl.BlockSpec((1, C, 1), lambda b, p, t: (b, 0, 0)),     # 1 + gamma
                pl.BlockSpec((1, C, 1), lambda b, p, t: (b, 0, 0)),     # beta
                pl.BlockSpec((1, C, thw), lambda b, p, t: (b, 0, t)),   # x tile
            ],
            # During the stats pass (p == 0) the output index stays pinned at
            # (b, 0) and is never written, so no wasted writebacks happen; the
            # normalize pass (p == 1) writes each lane-dense tile exactly once.
            out_specs=pl.BlockSpec((1, C, thw), lambda b, p, t: (b, 0, p * t)),
            scratch_shapes=[
                pltpu.VMEM((C, 1), jnp.float32),   # running sum   -> mean
                pltpu.VMEM((C, 1), jnp.float32),   # running sumsq -> rstd
            ],
        ),
        compiler_params=pltpu.CompilerParams(
            dimension_semantics=("parallel", "arbitrary", "arbitrary"),
            vmem_limit_bytes=32 * 1024 * 1024,
        ),
    )(gamma1, beta, x)

    return out.reshape(B, C, H, W)


def adain_ref(x_nchw, s, fc_w, fc_b):
    """Pure-JAX reference mirroring the PyTorch forward."""
    h = s @ fc_w.T + fc_b                              # (B, 2C)
    B, C = x_nchw.shape[:2]
    gamma = h[:, :C].reshape(B, C, 1, 1)
    beta = h[:, C:].reshape(B, C, 1, 1)
    mean = jnp.mean(x_nchw, axis=(2, 3), keepdims=True)
    var = jnp.var(x_nchw, axis=(2, 3), keepdims=True)  # biased, like InstanceNorm2d
    xn = (x_nchw - mean) / jnp.sqrt(var + EPS)
    return (1.0 + gamma) * xn + beta


if __name__ == "__main__":
    key = jax.random.PRNGKey(0)

    # Case 1: module-sized shapes (num_features=4, style_dim=8), single spatial tile.
    B, C, H, W = 2, 4, 16, 16
    STYLE = 8
    kx, ks, kw, kb, k2 = jax.random.split(key, 5)
    x = jax.random.normal(kx, (B, C, H, W), dtype=jnp.float32)
    s = jax.random.normal(ks, (B, STYLE), dtype=jnp.float32)
    bound = 1.0 / (STYLE ** 0.5)
    fc_w = jax.random.uniform(kw, (2 * C, STYLE), jnp.float32, -bound, bound)
    fc_b = jax.random.uniform(kb, (2 * C,), jnp.float32, -bound, bound)

    out = jax.block_until_ready(adain_nchw(x, s, fc_w, fc_b))
    ref = adain_ref(x, s, fc_w, fc_b)
    assert out.shape == (B, C, H, W)
    assert jnp.allclose(out, ref, atol=1e-4, rtol=1e-4), float(
        jnp.max(jnp.abs(out - ref)))

    # Case 2: force the tiled two-pass path (tiny VMEM budget -> 4 spatial tiles).
    B2, C2, H2, W2 = 2, 8, 32, 32
    k2x, k2s = jax.random.split(k2)
    x2 = jax.random.normal(k2x, (B2, C2, H2, W2), dtype=jnp.float32)
    s2 = jax.random.normal(k2s, (B2, STYLE), dtype=jnp.float32)
    fc_w2 = jax.random.uniform(kw, (2 * C2, STYLE), jnp.float32, -bound, bound)
    fc_b2 = jax.random.uniform(kb, (2 * C2,), jnp.float32, -bound, bound)

    out2 = jax.block_until_ready(
        adain_nchw(x2, s2, fc_w2, fc_b2, vmem_budget_bytes=64 * 1024))
    ref2 = adain_ref(x2, s2, fc_w2, fc_b2)
    assert out2.shape == (B2, C2, H2, W2)
    assert jnp.allclose(out2, ref2, atol=1e-4, rtol=1e-4), float(
        jnp.max(jnp.abs(out2 - ref2)))

    print("KERNEL_OK")
</pallas_src>

<mosaic_0001>
module attributes {stable_mosaic.version = 11 : i64} {
  func.func @_adain_kernel(%arg0: i32, %arg1: i32, %arg2: i32, %arg3: memref<1x4x1xf32, #tpu.memory_space<vmem>>, %arg4: memref<1x4x1xf32, #tpu.memory_space<vmem>>, %arg5: memref<1x4x256xf32, #tpu.memory_space<vmem>>, %arg6: memref<1x4x256xf32, #tpu.memory_space<vmem>>, %arg7: memref<4x1xf32, #tpu.memory_space<vmem>>, %arg8: memref<4x1xf32, #tpu.memory_space<vmem>>) attributes {dimension_semantics = [#tpu.dimension_semantics<parallel>, #tpu.dimension_semantics<arbitrary>, #tpu.dimension_semantics<arbitrary>], iteration_bounds = array<i64: 2, 2, 1>, scalar_prefetch = 0 : i64, scratch_operands = 2 : i64, tpu.core_type = #tpu.core_type<tc>, window_params = [{transform_indices = @transform_0, window_bounds = array<i64: 1, 4, 1>}, {transform_indices = @transform_1, window_bounds = array<i64: 1, 4, 1>}, {transform_indices = @transform_2, window_bounds = array<i64: 1, 4, 256>}, {transform_indices = @transform_3, window_bounds = array<i64: 1, 4, 256>}]} {
    %c0_i32 = arith.constant 0 : i32
    %0 = arith.cmpi eq, %arg1, %c0_i32 : i32
    %1 = arith.extui %0 : i1 to i32
    %c0_i32_0 = arith.constant 0 : i32
    %2 = arith.cmpi ne, %1, %c0_i32_0 : i32
    scf.if %2 {
      %c0_i32_2 = arith.constant 0 : i32
      %6 = arith.cmpi eq, %arg2, %c0_i32_2 : i32
      %7 = arith.extui %6 : i1 to i32
      %c0_i32_3 = arith.constant 0 : i32
      %8 = arith.cmpi ne, %7, %c0_i32_3 : i32
      scf.if %8 {
        %cst_17 = arith.constant 0.000000e+00 : f32
        %25 = vector.broadcast %cst_17 : f32 to vector<4x1xf32>
        %c0_18 = arith.constant 0 : index
        %c0_19 = arith.constant 0 : index
        %26 = vector.load %arg7[%c0_18, %c0_19] : memref<4x1xf32, #tpu.memory_space<vmem>>, vector<4x1xf32>
        tpu.vector_store %arg7[%c0_18, %c0_19], %25 {strides = array<i32>} : memref<4x1xf32, #tpu.memory_space<vmem>>, vector<4x1xf32>,
        %cst_20 = arith.constant 0.000000e+00 : f32
        %27 = vector.broadcast %cst_20 : f32 to vector<4x1xf32>
        %c0_21 = arith.constant 0 : index
        %c0_22 = arith.constant 0 : index
        %28 = vector.load %arg8[%c0_21, %c0_22] : memref<4x1xf32, #tpu.memory_space<vmem>>, vector<4x1xf32>
        tpu.vector_store %arg8[%c0_21, %c0_22], %27 {strides = array<i32>} : memref<4x1xf32, #tpu.memory_space<vmem>>, vector<4x1xf32>,
      } else {
      }
      %c0 = arith.constant 0 : index
      %c0_4 = arith.constant 0 : index
      %c0_5 = arith.constant 0 : index
      %9 = vector.load %arg5[%c0, %c0_4, %c0_5] : memref<1x4x256xf32, #tpu.memory_space<vmem>>, vector<1x4x256xf32>
      %10 = vector.shape_cast %9 : vector<1x4x256xf32> to vector<4x256xf32>
      %c0_6 = arith.constant 0 : index
      %c0_7 = arith.constant 0 : index
      %11 = vector.load %arg7[%c0_6, %c0_7] : memref<4x1xf32, #tpu.memory_space<vmem>>, vector<4x1xf32>
      %cst = arith.constant dense<0.000000e+00> : vector<4xf32>
      %12 = vector.multi_reduction <add>, %10, %cst [1] : vector<4x256xf32> to vector<4xf32>
      %13 = vector.shape_cast %12 : vector<4xf32> to vector<4x1xf32>
      %14 = arith.addf %11, %13 : vector<4x1xf32>
      %c0_8 = arith.constant 0 : index
      %c0_9 = arith.constant 0 : index
      %15 = vector.load %arg7[%c0_8, %c0_9] : memref<4x1xf32, #tpu.memory_space<vmem>>, vector<4x1xf32>
      tpu.vector_store %arg7[%c0_8, %c0_9], %14 {strides = array<i32>} : memref<4x1xf32, #tpu.memory_space<vmem>>, vector<4x1xf32>,
      %c0_10 = arith.constant 0 : index
      %c0_11 = arith.constant 0 : index
      %16 = vector.load %arg8[%c0_10, %c0_11] : memref<4x1xf32, #tpu.memory_space<vmem>>, vector<4x1xf32>
      %17 = arith.mulf %10, %10 : vector<4x256xf32>
      %cst_12 = arith.constant dense<0.000000e+00> : vector<4xf32>
      %18 = vector.multi_reduction <add>, %17, %cst_12 [1] : vector<4x256xf32> to vector<4xf32>
      %19 = vector.shape_cast %18 : vector<4xf32> to vector<4x1xf32>
      %20 = arith.addf %16, %19 : vector<4x1xf32>
      %c0_13 = arith.constant 0 : index
      %c0_14 = arith.constant 0 : index
      %21 = vector.load %arg8[%c0_13, %c0_14] : memref<4x1xf32, #tpu.memory_space<vmem>>, vector<4x1xf32>
      tpu.vector_store %arg8[%c0_13, %c0_14], %20 {strides = array<i32>} : memref<4x1xf32, #tpu.memory_space<vmem>>, vector<4x1xf32>,
      %c0_i32_15 = arith.constant 0 : i32
      %22 = arith.cmpi eq, %arg2, %c0_i32_15 : i32
      %23 = arith.extui %22 : i1 to i32
      %c0_i32_16 = arith.constant 0 : i32
      %24 = arith.cmpi ne, %23, %c0_i32_16 : i32
      scf.if %24 {
        %c0_17 = arith.constant 0 : index
        %c0_18 = arith.constant 0 : index
        %25 = vector.load %arg7[%c0_17, %c0_18] : memref<4x1xf32, #tpu.memory_space<vmem>>, vector<4x1xf32>
        %cst_19 = arith.constant 3.906250e-03 : f32
        %26 = vector.broadcast %cst_19 : f32 to vector<4x1xf32>
        %27 = arith.mulf %25, %26 : vector<4x1xf32>
        %c0_20 = arith.constant 0 : index
        %c0_21 = arith.constant 0 : index
        %28 = vector.load %arg8[%c0_20, %c0_21] : memref<4x1xf32, #tpu.memory_space<vmem>>, vector<4x1xf32>
        %cst_22 = arith.constant 3.906250e-03 : f32
        %29 = vector.broadcast %cst_22 : f32 to vector<4x1xf32>
        %30 = arith.mulf %28, %29 : vector<4x1xf32>
        %31 = arith.mulf %27, %27 : vector<4x1xf32>
        %32 = arith.subf %30, %31 : vector<4x1xf32>
        %cst_23 = arith.constant 0.000000e+00 : f32
        %33 = vector.broadcast %cst_23 : f32 to vector<4x1xf32>
        %34 = arith.maximumf %32, %33 : vector<4x1xf32>
        %c0_24 = arith.constant 0 : index
        %c0_25 = arith.constant 0 : index
        %35 = vector.load %arg7[%c0_24, %c0_25] : memref<4x1xf32, #tpu.memory_space<vmem>>, vector<4x1xf32>
        tpu.vector_store %arg7[%c0_24, %c0_25], %27 {strides = array<i32>} : memref<4x1xf32, #tpu.memory_space<vmem>>, vector<4x1xf32>,
        %cst_26 = arith.constant 9.99999974E-6 : f32
        %36 = vector.broadcast %cst_26 : f32 to vector<4x1xf32>
        %37 = arith.addf %34, %36 : vector<4x1xf32>
        %38 = math.rsqrt %37 : vector<4x1xf32>
        %c0_27 = arith.constant 0 : index
        %c0_28 = arith.constant 0 : index
        %39 = vector.load %arg8[%c0_27, %c0_28] : memref<4x1xf32, #tpu.memory_space<vmem>>, vector<4x1xf32>
        tpu.vector_store %arg8[%c0_27, %c0_28], %38 {strides = array<i32>} : memref<4x1xf32, #tpu.memory_space<vmem>>, vector<4x1xf32>,
      } else {
      }
    } else {
    }
    %c1_i32 = arith.constant 1 : i32
    %3 = arith.cmpi eq, %arg1, %c1_i32 : i32
    %4 = arith.extui %3 : i1 to i32
    %c0_i32_1 = arith.constant 0 : i32
    %5 = arith.cmpi ne, %4, %c0_i32_1 : i32
    scf.if %5 {
      %c0 = arith.constant 0 : index
      %c0_2 = arith.constant 0 : index
      %c0_3 = arith.constant 0 : index
      %6 = vector.load %arg5[%c0, %c0_2, %c0_3] : memref<1x4x256xf32, #tpu.memory_space<vmem>>, vector<1x4x256xf32>
      %7 = vector.shape_cast %6 : vector<1x4x256xf32> to vector<4x256xf32>
      %c0_4 = arith.constant 0 : index
      %c0_5 = arith.constant 0 : index
      %8 = vector.load %arg7[%c0_4, %c0_5] : memref<4x1xf32, #tpu.memory_space<vmem>>, vector<4x1xf32>
      %9 = vector.broadcast %8 : vector<4x1xf32> to vector<4x256xf32>
      %10 = arith.subf %7, %9 : vector<4x256xf32>
      %c0_6 = arith.constant 0 : index
      %c0_7 = arith.constant 0 : index
      %11 = vector.load %arg8[%c0_6, %c0_7] : memref<4x1xf32, #tpu.memory_space<vmem>>, vector<4x1xf32>
      %12 = vector.broadcast %11 : vector<4x1xf32> to vector<4x256xf32>
      %13 = arith.mulf %10, %12 : vector<4x256xf32>
      %c0_8 = arith.constant 0 : index
      %c0_9 = arith.constant 0 : index
      %c0_10 = arith.constant 0 : index
      %14 = vector.load %arg3[%c0_8, %c0_9, %c0_10] : memref<1x4x1xf32, #tpu.memory_space<vmem>>, vector<1x4x1xf32>
      %15 = vector.shape_cast %14 : vector<1x4x1xf32> to vector<4x1xf32>
      %16 = vector.broadcast %15 : vector<4x1xf32> to vector<4x256xf32>
      %17 = arith.mulf %16, %13 : vector<4x256xf32>
      %c0_11 = arith.constant 0 : index
      %c0_12 = arith.constant 0 : index
      %c0_13 = arith.constant 0 : index
      %18 = vector.load %arg4[%c0_11, %c0_12, %c0_13] : memref<1x4x1xf32, #tpu.memory_space<vmem>>, vector<1x4x1xf32>
      %19 = vector.shape_cast %18 : vector<1x4x1xf32> to vector<4x1xf32>
      %20 = vector.broadcast %19 : vector<4x1xf32> to vector<4x256xf32>
      %21 = arith.addf %17, %20 : vector<4x256xf32>
      %c0_14 = arith.constant 0 : index
      %c0_15 = arith.constant 0 : index
      %c0_16 = arith.constant 0 : index
      %22 = vector.load %arg6[%c0_14, %c0_15, %c0_16] : memref<1x4x256xf32, #tpu.memory_space<vmem>>, vector<1x4x256xf32>
      %23 = vector.shape_cast %22 : vector<1x4x256xf32> to vector<4x256xf32>
      %24 = vector.shape_cast %21 : vector<4x256xf32> to vector<1x4x256xf32>
      tpu.vector_store %arg6[%c0_14, %c0_15, %c0_16], %24 {strides = array<i32>} : memref<1x4x256xf32, #tpu.memory_space<vmem>>, vector<1x4x256xf32>,
    } else {
    }
    return
  }
  func.func @transform_0(%arg0: i32, %arg1: i32, %arg2: i32) -> (i32, i32, i32) {
    %c0_i32 = arith.constant 0 : i32
    %c0_i32_0 = arith.constant 0 : i32
    %c0_i32_1 = arith.constant 0 : i32
    return %arg0, %c0_i32, %c0_i32_0 : i32, i32, i32
  }
  func.func @transform_1(%arg0: i32, %arg1: i32, %arg2: i32) -> (i32, i32, i32) {
    %c0_i32 = arith.constant 0 : i32
    %c0_i32_0 = arith.constant 0 : i32
    %c0_i32_1 = arith.constant 0 : i32
    return %arg0, %c0_i32, %c0_i32_0 : i32, i32, i32
  }
  func.func @transform_2(%arg0: i32, %arg1: i32, %arg2: i32) -> (i32, i32, i32) {
    %c0_i32 = arith.constant 0 : i32
    %c0_i32_0 = arith.constant 0 : i32
    return %arg0, %c0_i32, %arg2 : i32, i32, i32
  }
  func.func @transform_3(%arg0: i32, %arg1: i32, %arg2: i32) -> (i32, i32, i32) {
    %0 = arith.muli %arg1, %arg2 : i32
    %c0_i32 = arith.constant 0 : i32
    %c0_i32_0 = arith.constant 0 : i32
    return %arg0, %c0_i32, %0 : i32, i32, i32
  }
}

</mosaic_0001>

<bundles_post_ra>
// kernel: tpu_custom_call.1
= control target key start
LH: loop header
LB: loop body
LE: loop exit
PB: predicated region body
PF: predicated region fallthrough
CT: control target
= control target key end

     0   :  { %8 = vsyncpa [#allocation5], 0  ;;  %s855_s0 = inlined_call_operand.vmem [shape: f32[2,4,1], index: 0, kind: input, shape index: {}]   ;;  %s856_s1 = inlined_call_operand.vmem [shape: f32[2,4,1], index: 1, kind: input, shape index: {}]   ;;  %s857_s2 = inlined_call_operand.vmem [shape: f32[2,4,256], index: 2, kind: input, shape index: {}]   ;;  %s858_s3 = inlined_call_operand.hbm [shape: f32[2,4,256], index: 3, kind: output, shape index: {}]  }
   0x1   :  { %10 = vsyncpa [#allocation5 + $0x1], 0  ;;  %s694_s12 = smov 0   ;;  %s696_s13 = smov 0  }
   0x2   :  { %s698_s14 = smov 0   ;;  %s700_s15 = smov 0  }
   0x3   :  { %s702_s16 = smov 0   ;;  %s704_s17 = smov 0  }
   0x4   :  { %s706_s18 = smov 0   ;;  %s708_s19 = smov 0  }
   0x5 LB: > { %s476_s20 = sadd.s32 4294967295, %s668_s19   ;;  %s477_s21 = sadd.s32 4294967294, %s668_s19   ;;  %s668_s19 = sphi %s708_s19, %s16_s19   ;;  %s664_s18 = sphi %s706_s18, %s869_s18   ;;  %s660_s17 = sphi %s704_s17, %s868_s17   ;;  %s656_s16 = sphi %s702_s16, %s867_s16   ;;  %s652_s15 = sphi %s700_s15, %s866_s15   ;;  %s648_s14 = sphi %s698_s14, %s865_s14   ;;  %s644_s13 = sphi %s696_s13, %s864_s13   ;;  %s640_s12 = sphi %s694_s12, %s863_s12  }
   0x6   : > { %s31_s22 = sadd.s32 1, %s660_s17  ;;  %s35_s23 = sadd.s32 1, %s664_s18 }
   0x7   : > { %p33_p0 = scmp.ge.s32.totalorder %s31_s22, 2  ;;  %p136_p1 = scmp.ne.s32.totalorder %s648_s14, %s644_s13 }
   0x8   : > { %p137_p2 = scmp.eq.s32.totalorder %s476_s20, 3  ;;  %p142_p4 = scmp.ne.s32.totalorder %s644_s13, %s640_s12 }
   0x9   : > { %s871_s22 = smov (%p33_p0, %s31_s22), 0  ;;  %s873_s23 = smov (!%p33_p0, %s35_s23), %s664_s18 }
   0xa   : > { %p743_p3 = por %p137_p2, %p136_p1  ;;  %p37_p5 = scmp.ge.s32.totalorder %s873_s23, 2 }
   0xb   : > { %p143_p6 = scmp.eq.s32.totalorder %s477_s21, 3  ;;  %p480_p7 = scmp.ge.s32.totalorder %s668_s19, 1 }
   0xc   : > { %p188_p8 = scmp.lt.s32.totalorder %s668_s19, 5  ;;  %s875_s23 = smov (%p37_p5, %s873_s23), 0 }
   0xd   : > { %p753_p9 = por %p143_p6, %p142_p4  ;;  %s121_s26 = ssub.s32 %s664_s18, %s875_s23 }
   0xe   : > { %p189_p10 = pnand %p480_p7, %p188_p8  ;;  %s126_s27 = sadd.s32 1, %s648_s14 }
   0xf   : > { %p124_p11 = scmp.eq.s32.totalorder %s121_s26, 0  ;;  %s859_s29 = sand.u32 (!%p189_p10), 1, %s644_s13  }
  0x10   : > { %192 = sbr.rel (%p189_p10) target bundleno = 383 (0x17f), region = 32  ;;  %p224_p12 = scmp.lt.s32.totalorder (!%p189_p10), %s656_s16, 1 }
  0x11   : > { %s761_s28 = scalar_select %p124_p11, %s648_s14, %s126_s27  }
  0x12   : > { %s767_s30 = sshll.u32 (!%p189_p10), %s859_s29, 3  ;;  %p486_p13 = scmp.ne.s32.totalorder (!%p189_p10), %s652_s15, 0 }
  0x13   : > { %s223_s29 = scalar_lea.vmem (!%p189_p10), [#allocation4], %s767_s30 }
  0x17   : > { %s225_s4 = scalar_select %p224_p12, %s656_s16, 1 }
  0x18   : > { %247 = sbr.rel (%p486_p13) target bundleno = 210 (0xd2), region = 36  ;;  %vm260_vm0 = vcmask (!%p486_p13), 1043456   ;;  %vm252_vm1 = vcmask (!%p486_p13), 3072   ;;  %v670_v10 = vmov (!%p486_p13), 0.0  }
  0x19   : > { %s482_s5 = sshll.u32 %s225_s4, 2  ;;  %s493_s6 = sshll.u32 %s225_s4, 3  ;;  %253 = vst.msk [vmem:[#allocation2] sm:$0xf] (!%p486_p13), %vm252_vm1, %v670_v10  ;;  %254 = vst.msk [vmem:[#allocation3] sm:$0xf] (!%p486_p13), %vm252_vm1, %v670_v10 }
  0x1a   : > { %s773_s9 = scalar_lea.vmem %s855_s0, %s482_s5  ;;  %s778_s20 = scalar_lea.vmem %s856_s1, %s482_s5 }
  0x1b   : > { %s783_s27 = scalar_lea.vmem %s857_s2, %s493_s6 }
  0x1c   : > { %v255_v0 = vld [vmem:[%s783_s27] sm:$0xff] (!%p486_p13) }
  0x1d   : > { %v258_v1 = vcombine.high (!%p486_p13), %v255_v0, %v255_v0  ;;  %v261_v2 = vsel (!%p486_p13), %vm260_vm0, %v255_v0, 0.0  ;;  %v270_v3 = vmul.f32 (!%p486_p13), %v255_v0, %v255_v0 }
  0x1f   : > { %v262_v4 = vsel %vm260_vm0, %v258_v1, 0.0  ;;  %v272_v5 = vcombine.high %v270_v3, %v270_v3  ;;  %v274_v6 = vsel %vm260_vm0, %v270_v3, 0.0 }
  0x20   : > { %v263_v7 = vadd.f32 %v262_v4, %v261_v2  ;;  %v256_v11 = vld [vmem:[#allocation2] sm:$0xf]  ;;  %v269_v14 = vld [vmem:[#allocation3] sm:$0xf] }
  0x21   : > { %v275_v8 = vsel %vm260_vm0, %v272_v5, 0.0 }
  0x22   : > { %264 = vadd.xlane.f32.xlu0 %v263_v7  ;;  %v276_v9 = vadd.f32 %v275_v8, %v274_v6 }
  0x26   : > { %277 = vadd.xlane.f32.xlu0 %v276_v9 }
  0xaf   : > { %v265_v12 = vpop.xlane.xlu0 %264 }
  0xb0   : > { %v266_v13 = vadd.f32 %v265_v12, %v256_v11 }
  0xb2   : > { %268 = vst.msk [vmem:[#allocation2] sm:$0xf] %vm252_vm1, %v266_v13 }
  0xb3   : > { %v278_v15 = vpop.xlane.xlu0 %277 }
  0xb4   : > { %v279_v16 = vadd.f32 %v278_v15, %v269_v14 }
  0xb6   : > { %280 = vst.msk [vmem:[#allocation3] sm:$0xf] %vm252_vm1, %v279_v16 }
  0xb9   : > { %v284_v17 = vld [vmem:[#allocation2] sm:$0xf] }
  0xba   : > { %v285_v18 = vmul.f32 0.00390625, %v284_v17 }
  0xbc   : > { %291 = vst.msk [vmem:[#allocation2] sm:$0xf] %vm252_vm1, %v285_v18  ;;  %v288_v20 = vmul.f32 %v285_v18, %v285_v18 }
  0xbd   : > { %v286_v19 = vld [vmem:[#allocation3] sm:$0xf] }
  0xbe   : > { %v287_v21 = vmul.f32 0.00390625, %v286_v19 }
  0xc0   : > { %v289_v22 = vsub.f32 %v287_v21, %v288_v20 }
  0xc2   : > { %v290_v23 = vmax.f32 %v289_v22, 0.0 }
  0xc4   : > { %v292_v24 = vadd.f32 1e-05, %v290_v23 }
  0xc6   : > { %570 = vrsqrt.f32 %v292_v24 }
  0xd0   : > { %v571_v25 = vpop.eup %570 }
  0xd1   : > { %294 = vst.msk [vmem:[#allocation3] sm:$0xf] %vm252_vm1, %v571_v25 }
  0xd2 PF: > { %p487_p0 = scmp.ne.s32.totalorder %s652_s15, 1 }
  0xd3   : > { %v300_v26 = vld [vmem:[#allocation2] sm:$0xf] (!%p487_p0)  ;;  %v328_v27 = vld [vmem:[%s773_s9] sm:$0xf] (!%p487_p0)  ;;  %v671_v28 = vmov (!%p487_p0), 0   ;;  %v308_v33 = vlaneseq (!%p487_p0) }
  0xd4   : > { %298 = sbr.rel (%p487_p0) target bundleno = 358 (0x166), region = 48  ;;  %572 = vset.pattern.permute.xlu0 (!%p487_p0), %v671_v28  ;;  %573 = vset.pattern.permute.xlu1 (!%p487_p0), %v671_v28  ;;  %v339_v30 = vld [vmem:[%s778_s20] sm:$0xf] (!%p487_p0)  ;;  %v672_v31 = vmov (!%p487_p0), 839922192  }
  0xd5   : > { %303 = vperm.xlu0 (!%p487_p0), %572, %v300_v26   ;;  %331 = vperm.xlu1 (!%p487_p0), %573, %v328_v27   ;;  %v306_v32 = vunpack.c.l.s4 (!%p487_p0), %v672_v31  ;;  %v309_v35 = vshrl.u32 (!%p487_p0), %v308_v33, 7  ;;  %v299_v39 = vld [vmem:[%s783_s27] sm:$0xff] (!%p487_p0) }
  0xd7   : > { %v307_v34 = vunpack.c.0.s8 (!%p487_p0), %v306_v32 }
  0xd8   : > { %v314_v29 = vld [vmem:[#allocation3] sm:$0xf] (!%p487_p0) }
  0xd9   : > { %317 = vperm.xlu0 (!%p487_p0), %572, %v314_v29   ;;  %342 = vperm.xlu1 (!%p487_p0), %573, %v339_v30   ;;  %v310_v36 = vsub.s32 (!%p487_p0), %v307_v34, %v309_v35 }
 0x154   : > { %v304_v37 = vpop.permute.xlu0 %303  ;;  %v332_v43 = vpop.permute.xlu1 %331 }
 0x155   : > { %v311_v38 = vrot.slane %v304_v37, %v310_v36 }
 0x157   : > { %v313_v41 = vsub.f32 %v299_v39, %v311_v38 }
 0x158   : > { %v318_v40 = vpop.permute.xlu0 %317  ;;  %v343_v48 = vpop.permute.xlu1 %342 }
 0x159   : > { %v325_v42 = vrot.slane %v318_v40, %v310_v36 }
 0x15b   : > { %v327_v44 = vmul.f32 %v325_v42, %v313_v41 }
 0x15d   : > { %v335_v45 = vcombine.high %v327_v44, %v327_v44  ;;  %v337_v46 = vmul.f32 %v332_v43, %v327_v44 }
 0x15f   : > { %v338_v47 = vmul.f32 %v335_v45, %v332_v43  ;;  %v345_v49 = vadd.f32 %v343_v48, %v337_v46 }
 0x161   : > { %v346_v50 = vadd.f32 %v343_v48, %v338_v47 }
 0x163   : > { %v349_v51 = vcombine.low %v345_v49, %v346_v50 }
 0x165   : > { %351 = vst [vmem:[%s223_s29] sm:$0xff] %v349_v51 }
 0x166 PF: > { %s494_s15 = sshll.u32 %s656_s16, 7  ;;  %s370_s7 = sshll.u32 %s223_s29, 4  ;;  %s371_s7 = int_to_ptr.vmem [resolvable:$true] %s370_s7 }
 0x167   : > { %s804_s6 = scalar_lea.hbm %s858_s3, %s494_s15  ;;  %s862_s8 = sand.u32 1, %s644_s13  }
 0x168   : > { %s353_s9 = scalar_lea.sflag [#allocation5], %s862_s8  ;;  %s574_s10 = scalar_lea.vmem %s371_s7, 128 }
 0x169   : > { %p575_p1 = scmp.ne.s32.totalorder %s371_s7, %s574_s10  ;;  %s673_s11 = smov [#allocation4]  }
 0x16a   : > { %s578_s20 = sshll.u32 %s673_s11, 4  ;;  %s579_s20 = int_to_ptr.vmem [resolvable:$false] %s578_s20 }
 0x16b   : > { %p576_p2 = pnand %p575_p1, %p743_p3  ;;  %s580_s21 = scalar_lea.vmem %s579_s20, 256 }
 0x16c   : > { %p581_p5 = scmp.lt.s32.totalorder %s371_s7, %s579_s20  ;;  %p582_p6 = scmp.lt.s32.totalorder %s580_s21, %s574_s10 }
 0x16d   : > { %p577_p4 = pneg %p576_p2 }
 0x16e   : > { %p583_p7 = por %p582_p6, %p581_p5 }
 0x170   : > { %p584_p8 = pnand %p583_p7, %p577_p4 }
 0x172   : > { %587 = shalt.err (!%p584_p8)
}
 0x173   : > { %s588_s16 = scalar_lea.hbm %s804_s6, 128  ;;  %s592_s26 = scalar_lea.hbm %s858_s3, 256 }
 0x174   : > { %p589_p10 = scmp.ne.s32.totalorder %s804_s6, %s588_s16  ;;  %p593_p13 = scmp.lt.u32.totalorder %s804_s6, %s858_s3 }
 0x175   : > { %p594_p0 = scmp.lt.u32.totalorder %s592_s26, %s588_s16  ;;  %p596_p2 = scmp.lt.u32.totalorder %s588_s16, %s804_s6 }
 0x176   : > { %p590_p11 = pnand %p589_p10, %p743_p3 }
 0x177   : > { %p595_p1 = por %p594_p0, %p593_p13 }
 0x178   : > { %p591_p12 = pneg %p590_p11 }
 0x179   : > { %p597_p4 = por %p596_p2, %p595_p1 }
 0x17b   : > { %p598_p5 = pnand %p597_p4, %p591_p12 }
 0x17d   : > { %601 = shalt.err (!%p598_p5)
}
 0x17e   : > { %495 = dma.vmem_to_hbm [thread:$0]  (%p743_p3), %s371_s7, 128, %s804_s6, %s353_s9  }
 0x17f PF: > { %p501_p6 = scmp.ge.s32.totalorder %s668_s19, 2  ;;  %s382_s4 = sand.u32 1, %s640_s12  }
 0x180   : > { %s383_s5 = scalar_lea.sflag [#allocation5], %s382_s4 }
 0x181   : > { %p498_p7 = pnand %p501_p6, %p753_p9 }
 0x183   : > { %635 = dma.done.wait (!%p498_p7), %s383_s5, 128  }
 0x184   : > { %637 = vsyncadd (!%p498_p7), %s383_s5, 4294967168  ;;  %s16_s19 = sadd.s32 1, %s668_s19   ;;  %s863_s12 = smov %s644_s13 }
 0x185   : > { %p13_p8 = scmp.ge.s32.totalorder %s16_s19, 6   ;;  %s864_s13 = smov %s648_s14 }
 0x186   : > { %s865_s14 = smov %s761_s28  ;;  %s866_s15 = smov %s660_s17 }
 0x187   : > { %s867_s16 = smov %s664_s18  ;;  %s868_s17 = smov %s871_s22 }
 0x188   : > { %s869_s18 = smov %s875_s23  ;;  %15 = sbr.rel (!%p13_p8) target bundleno = 5 (0x5), region = 89 }
 0x18f   :  { %388 = vsyncpa [#allocation5], 1 }
 0x190   :  { %390 = vsyncpa [#allocation5 + $0x1], 1 }

</bundles_post_ra>
